<compile_context>
chip_gen: v7x
topology: tpu7x:2x2x1
jax: 0.10.0
libtpu: 0.0.40
codegen_flags: <defaults>
</compile_context>

<pallas_src>
import math

import jax
import jax.numpy as jnp
from jax import lax
from jax.experimental import pallas as pl
from jax.experimental.pallas import tpu as pltpu

# Full-f32 matmuls everywhere (wrapper GEMMs, in-kernel dots, reference) so the
# kernel matches the PyTorch-style f32 math tightly.
jax.config.update("jax_default_matmul_precision", "highest")

CHUNK = 8  # timesteps per grid iteration (sublane-aligned)


def _mlstm_chunk_kernel(
    fl_ref,   # SMEM (n_chunks,)  f_L = prod of forget gates in chunk
    q_ref,    # VMEM (L, H)   Wq x + bq              (rows)
    k_ref,    # VMEM (L, M)   (Wk x + bk)/sqrt(M)    (rows)
    v_ref,    # VMEM (L, M)   Wv x + bv              (rows)
    o_ref,    # VMEM (L, H)   sigmoid(Wo x + bo)     (rows)
    d_ref,    # VMEM (L, L)   decay/gate matrix D[t,s] = (a_t/a_s) i_s, s<=t
    a_ref,    # VMEM (L, 1)   a_t = prod_{s<=t} f_s  (within-chunk)
    g_ref,    # VMEM (L, 1)   g_s = (f_L/a_s) i_s
    ct0_ref,  # VMEM (M, M)   initial C^T
    n0_ref,   # VMEM (1, M)   initial n (row)
    h_ref,    # out VMEM (L, H)
    ct_ref,   # out VMEM (M, M)  final C^T  (VMEM-resident accumulator)
    n_ref,    # out VMEM (1, M)  final n    (VMEM-resident accumulator)
):
    c = pl.program_id(0)

    # Seed the VMEM-resident state on the first chunk only.
    @pl.when(c == 0)
    def _():
        ct_ref[...] = ct0_ref[...]
        n_ref[...] = n0_ref[...]

    hi = lax.Precision.HIGHEST
    f32 = jnp.float32

    q = q_ref[...]
    k = k_ref[...]
    v = v_ref[...]
    d = d_ref[...]
    a = a_ref[...]
    ct = ct_ref[...]
    n = n_ref[...]

    # Intra-chunk scores: S[t, s] = q_t . k_s   (requires H == M).
    s = lax.dot_general(q, k, (((1,), (1,)), ((), ())),
                        precision=hi, preferred_element_type=f32)   # (L, L)
    sd = s * d                                                      # gated/decayed

    # Readout numerator rows: (C_t q_t)^T = a_t * (q_t @ C0^T) + (S∘D) @ V.
    inter = lax.dot_general(q, ct, (((1,), (0,)), ((), ())),
                            precision=hi, preferred_element_type=f32)  # (L, M)
    intra = lax.dot_general(sd, v, (((1,), (0,)), ((), ())),
                            precision=hi, preferred_element_type=f32)  # (L, M)
    h_num = a * inter + intra

    # Normalizer: n_t^T q_t = a_t * (n0 . q_t) + rowsum(S∘D).
    nq = a * jnp.sum(q * n, axis=-1, keepdims=True) + \
        jnp.sum(sd, axis=-1, keepdims=True)                         # (L, 1)
    denom = jnp.maximum(jnp.abs(nq), 1.0)
    h_ref[...] = o_ref[...] * (h_num / denom)

    # Chunk-end state update (state kept transposed: C^T).
    fl = fl_ref[c]
    gk = g_ref[...] * k                                             # (L, M)
    ct_ref[...] = fl * ct + lax.dot_general(
        gk, v, (((0,), (0,)), ((), ())),
        precision=hi, preferred_element_type=f32)                   # (M, M)
    n_ref[...] = fl * n + jnp.sum(gk, axis=0, keepdims=True)        # (1, M)


@jax.jit
def mlstm_sequence(params, xs, states):
    """Run the mLSTM recurrence over a sequence.

    xs: (T, input_size); states = (C (M, M), n (M, 1)) as in the PyTorch module.
    Returns (h_all (T, H), (C_final (M, M), n_final (M, 1))).
    """
    C_prev, n_prev = states
    T = xs.shape[0]
    H = params["Wq"].shape[0]
    M = params["Wk"].shape[0]
    if H != M:
        raise ValueError("mLSTM forward semantics require hidden_size == mem_dim")

    f32 = jnp.float32
    X = xs.astype(f32)                                        # (T, I)

    # --- Hoisted x-only projections: batched MXU GEMMs over the sequence. ---
    Q = X @ params["Wq"].astype(f32).T + params["bq"].astype(f32)[:, 0]
    K = (X @ params["Wk"].astype(f32).T + params["bk"].astype(f32)[:, 0]) * (
        1.0 / math.sqrt(M))
    V = X @ params["Wv"].astype(f32).T + params["bv"].astype(f32)[:, 0]
    O = jax.nn.sigmoid(X @ params["Wo"].astype(f32).T
                       + params["bo"].astype(f32)[:, 0])
    i_pre = X @ params["wi"].astype(f32)[0] + params["bi"].astype(f32)[0]  # (T,)
    f_pre = X @ params["wf"].astype(f32)[0] + params["bf"].astype(f32)[0]  # (T,)

    # --- Pad T up to a multiple of CHUNK with identity steps (i=0, f=1). ---
    L = CHUNK
    n_chunks = -(-T // L)
    Tp = n_chunks * L
    pad = Tp - T
    logf = jax.nn.log_sigmoid(f_pre)
    logi = i_pre
    if pad:
        Q = jnp.pad(Q, ((0, pad), (0, 0)))
        K = jnp.pad(K, ((0, pad), (0, 0)))
        V = jnp.pad(V, ((0, pad), (0, 0)))
        O = jnp.pad(O, ((0, pad), (0, 0)))
        logf = jnp.pad(logf, (0, pad))                            # f_t = 1
        logi = jnp.pad(logi, (0, pad), constant_values=-1e30)     # i_t = 0

    # --- Per-chunk decay quantities (log space, fully parallel). ---
    LI = logi.reshape(n_chunks, L)                                # log i_s
    cum = jnp.cumsum(logf.reshape(n_chunks, L), axis=1)           # log a_t
    a = jnp.exp(cum)                                              # (n_chunks, L)
    fL = a[:, -1]                                                 # (n_chunks,)
    tri = jnp.arange(L)[:, None] >= jnp.arange(L)[None, :]        # s <= t
    d_log = jnp.where(tri[None],
                      cum[:, :, None] - cum[:, None, :] + LI[:, None, :],
                      -1e30)
    D = jnp.exp(d_log)                                            # (n_chunks, L, L)
    g = jnp.exp(cum[:, -1:] - cum + LI)                           # (n_chunks, L)

    D_rows = D.reshape(Tp, L)
    a_col = a.reshape(Tp, 1)
    g_col = g.reshape(Tp, 1)

    h_pad, ct_out, n_out = pl.pallas_call(
        _mlstm_chunk_kernel,
        grid=(n_chunks,),
        in_specs=[
            pl.BlockSpec(memory_space=pltpu.MemorySpace.SMEM),     # f_L per chunk
            pl.BlockSpec((L, H), lambda c: (c, 0)),                # Q
            pl.BlockSpec((L, M), lambda c: (c, 0)),                # K (scaled)
            pl.BlockSpec((L, M), lambda c: (c, 0)),                # V
            pl.BlockSpec((L, H), lambda c: (c, 0)),                # sigmoid(O)
            pl.BlockSpec((L, L), lambda c: (c, 0)),                # D
            pl.BlockSpec((L, 1), lambda c: (c, 0)),                # a
            pl.BlockSpec((L, 1), lambda c: (c, 0)),                # g
            pl.BlockSpec((M, M), lambda c: (0, 0)),                # C0^T
            pl.BlockSpec((1, M), lambda c: (0, 0)),                # n0 row
        ],
        out_specs=(
            pl.BlockSpec((L, H), lambda c: (c, 0)),                # h rows
            pl.BlockSpec((M, M), lambda c: (0, 0)),                # C^T (resident)
            pl.BlockSpec((1, M), lambda c: (0, 0)),                # n   (resident)
        ),
        out_shape=(
            jax.ShapeDtypeStruct((Tp, H), f32),
            jax.ShapeDtypeStruct((M, M), f32),
            jax.ShapeDtypeStruct((1, M), f32),
        ),
        compiler_params=pltpu.CompilerParams(
            dimension_semantics=("arbitrary",)),
    )(fL, Q, K, V, O, D_rows, a_col, g_col,
      C_prev.astype(f32).T, n_prev.astype(f32).T)

    return h_pad[:T], (ct_out.T, n_out.T)


def mlstm_step(params, x, states):
    """Single step matching mLSTM.forward: x (I, 1) -> (ht (H, 1), (C, n))."""
    h_seq, new_states = mlstm_sequence(params, x.T, states)
    return h_seq.T, new_states


# ----------------------------- pure-JAX reference ---------------------------
def mlstm_ref_step(params, x, states):
    """Mirrors the PyTorch forward exactly (single step)."""
    C_prev, n_prev = states
    M = params["Wk"].shape[0]
    qt = params["Wq"] @ x + params["bq"]
    kt = (1.0 / math.sqrt(M)) * (params["Wk"] @ x + params["bk"])
    vt = params["Wv"] @ x + params["bv"]
    it = jnp.exp(params["wi"] @ x + params["bi"])             # (1, 1)
    ft = jax.nn.sigmoid(params["wf"] @ x + params["bf"])      # (1, 1)
    C = ft * C_prev + it * jnp.outer(vt[:, 0], kt[:, 0])
    n = ft * n_prev + it * kt
    max_nqt = jnp.maximum(jnp.abs(n.T @ qt), 1.0)
    h_tilde = (C @ qt) / max_nqt
    ot = jax.nn.sigmoid(params["Wo"] @ x + params["bo"])
    return ot * h_tilde, (C, n)


def make_params(key, input_size, hidden_size, mem_dim):
    ks = jax.random.split(key, 12)
    f32 = jnp.float32
    return {
        "Wq": jax.random.normal(ks[0], (hidden_size, input_size), f32),
        "bq": jax.random.normal(ks[1], (hidden_size, 1), f32),
        "Wk": jax.random.normal(ks[2], (mem_dim, input_size), f32),
        "bk": jax.random.normal(ks[3], (mem_dim, 1), f32),
        "Wv": jax.random.normal(ks[4], (mem_dim, input_size), f32),
        "bv": jax.random.normal(ks[5], (mem_dim, 1), f32),
        # input gate kept moderate so exp() stays well-conditioned in the test
        "wi": jax.random.normal(ks[6], (1, input_size), f32) * 0.1,
        "bi": jax.random.normal(ks[7], (1,), f32) * 0.1,
        "wf": jax.random.normal(ks[8], (1, input_size), f32),
        "bf": jax.random.normal(ks[9], (1,), f32),
        "Wo": jax.random.normal(ks[10], (hidden_size, input_size), f32),
        "bo": jax.random.normal(ks[11], (hidden_size, 1), f32),
    }


if __name__ == "__main__":
    input_size = 16
    hidden_size = 32
    mem_dim = 32            # forward semantics require hidden_size == mem_dim
    seq_len = 20            # spans multiple chunks + exercises padding

    key = jax.random.PRNGKey(0)
    kp, kx = jax.random.split(key)
    params = make_params(kp, input_size, hidden_size, mem_dim)

    xs = jax.random.normal(kx, (seq_len, input_size), jnp.float32)
    C0 = jnp.zeros((mem_dim, mem_dim), jnp.float32)     # init_hidden()
    n0 = jnp.zeros((mem_dim, 1), jnp.float32)

    # Fused chunkwise-parallel Pallas kernel.
    h_all, (C_f, n_f) = mlstm_sequence(params, xs, (C0, n0))
    jax.block_until_ready((h_all, C_f, n_f))

    # Step-by-step pure-JAX reference (mirrors the PyTorch forward).
    states = (C0, n0)
    h_rows = []
    for t in range(seq_len):
        ht_r, states = mlstm_ref_step(params, xs[t][:, None], states)
        h_rows.append(ht_r[:, 0])
    h_ref = jnp.stack(h_rows)
    C_ref, n_ref = states

    assert jnp.allclose(h_all, h_ref, rtol=1e-4, atol=1e-3), "h mismatch"
    assert jnp.allclose(C_f, C_ref, rtol=1e-4, atol=1e-3), "C mismatch"
    assert jnp.allclose(n_f, n_ref, rtol=1e-4, atol=1e-3), "n mismatch"

    # Single-step API (exercises the T=1 + chunk-padding identity path).
    ht1, (C1, n1) = mlstm_step(params, xs[0][:, None], (C0, n0))
    ht1_r, (C1_r, n1_r) = mlstm_ref_step(params, xs[0][:, None], (C0, n0))
    jax.block_until_ready((ht1, C1, n1))
    assert jnp.allclose(ht1, ht1_r, rtol=1e-4, atol=1e-3), "step h mismatch"
    assert jnp.allclose(C1, C1_r, rtol=1e-4, atol=1e-3), "step C mismatch"
    assert jnp.allclose(n1, n1_r, rtol=1e-4, atol=1e-3), "step n mismatch"

    print("KERNEL_OK")
</pallas_src>

<mosaic_0001>
module attributes {stable_mosaic.version = 11 : i64} {
  func.func @_mlstm_chunk_kernel(%arg0: i32, %arg1: memref<3xf32, #tpu.memory_space<smem>>, %arg2: memref<8x32xf32, #tpu.memory_space<vmem>>, %arg3: memref<8x32xf32, #tpu.memory_space<vmem>>, %arg4: memref<8x32xf32, #tpu.memory_space<vmem>>, %arg5: memref<8x32xf32, #tpu.memory_space<vmem>>, %arg6: memref<8x8xf32, #tpu.memory_space<vmem>>, %arg7: memref<8x1xf32, #tpu.memory_space<vmem>>, %arg8: memref<8x1xf32, #tpu.memory_space<vmem>>, %arg9: memref<32x32xf32, #tpu.memory_space<vmem>>, %arg10: memref<1x32xf32, #tpu.memory_space<vmem>>, %arg11: memref<8x32xf32, #tpu.memory_space<vmem>>, %arg12: memref<32x32xf32, #tpu.memory_space<vmem>>, %arg13: memref<1x32xf32, #tpu.memory_space<vmem>>) attributes {dimension_semantics = [#tpu.dimension_semantics<arbitrary>], iteration_bounds = array<i64: 3>, scalar_prefetch = 0 : i64, scratch_operands = 0 : i64, tpu.core_type = #tpu.core_type<tc>, window_params = [{transform_indices = @transform_0, window_bounds = array<i64: 3>}, {transform_indices = @transform_1, window_bounds = array<i64: 8, 32>}, {transform_indices = @transform_2, window_bounds = array<i64: 8, 32>}, {transform_indices = @transform_3, window_bounds = array<i64: 8, 32>}, {transform_indices = @transform_4, window_bounds = array<i64: 8, 32>}, {transform_indices = @transform_5, window_bounds = array<i64: 8, 8>}, {transform_indices = @transform_6, window_bounds = array<i64: 8, 1>}, {transform_indices = @transform_7, window_bounds = array<i64: 8, 1>}, {pipeline_mode = #tpu.pipeline_mode<synchronous>, transform_indices = @transform_8, window_bounds = array<i64: 32, 32>}, {pipeline_mode = #tpu.pipeline_mode<synchronous>, transform_indices = @transform_9, window_bounds = array<i64: 1, 32>}, {transform_indices = @transform_10, window_bounds = array<i64: 8, 32>}, {pipeline_mode = #tpu.pipeline_mode<synchronous>, transform_indices = @transform_11, window_bounds = array<i64: 32, 32>}, {pipeline_mode = #tpu.pipeline_mode<synchronous>, transform_indices = @transform_12, window_bounds = array<i64: 1, 32>}]} {
    %c0_i32 = arith.constant 0 : i32
    %0 = arith.cmpi eq, %arg0, %c0_i32 : i32
    %1 = arith.extui %0 : i1 to i32
    %c0_i32_0 = arith.constant 0 : i32
    %2 = arith.cmpi ne, %1, %c0_i32_0 : i32
    scf.if %2 {
      %c0_31 = arith.constant 0 : index
      %c0_32 = arith.constant 0 : index
      %49 = vector.load %arg9[%c0_31, %c0_32] : memref<32x32xf32, #tpu.memory_space<vmem>>, vector<32x32xf32>
      %c0_33 = arith.constant 0 : index
      %c0_34 = arith.constant 0 : index
      %50 = vector.load %arg12[%c0_33, %c0_34] : memref<32x32xf32, #tpu.memory_space<vmem>>, vector<32x32xf32>
      tpu.vector_store %arg12[%c0_33, %c0_34], %49 {strides = array<i32>} : memref<32x32xf32, #tpu.memory_space<vmem>>, vector<32x32xf32>,
      %c0_35 = arith.constant 0 : index
      %c0_36 = arith.constant 0 : index
      %51 = vector.load %arg10[%c0_35, %c0_36] : memref<1x32xf32, #tpu.memory_space<vmem>>, vector<1x32xf32>
      %c0_37 = arith.constant 0 : index
      %c0_38 = arith.constant 0 : index
      %52 = vector.load %arg13[%c0_37, %c0_38] : memref<1x32xf32, #tpu.memory_space<vmem>>, vector<1x32xf32>
      tpu.vector_store %arg13[%c0_37, %c0_38], %51 {strides = array<i32>} : memref<1x32xf32, #tpu.memory_space<vmem>>, vector<1x32xf32>,
    } else {
    }
    %c0 = arith.constant 0 : index
    %c0_1 = arith.constant 0 : index
    %3 = vector.load %arg2[%c0, %c0_1] : memref<8x32xf32, #tpu.memory_space<vmem>>, vector<8x32xf32>
    %c0_2 = arith.constant 0 : index
    %c0_3 = arith.constant 0 : index
    %4 = vector.load %arg3[%c0_2, %c0_3] : memref<8x32xf32, #tpu.memory_space<vmem>>, vector<8x32xf32>
    %c0_4 = arith.constant 0 : index
    %c0_5 = arith.constant 0 : index
    %5 = vector.load %arg4[%c0_4, %c0_5] : memref<8x32xf32, #tpu.memory_space<vmem>>, vector<8x32xf32>
    %c0_6 = arith.constant 0 : index
    %c0_7 = arith.constant 0 : index
    %6 = vector.load %arg6[%c0_6, %c0_7] : memref<8x8xf32, #tpu.memory_space<vmem>>, vector<8x8xf32>
    %c0_8 = arith.constant 0 : index
    %c0_9 = arith.constant 0 : index
    %7 = vector.load %arg7[%c0_8, %c0_9] : memref<8x1xf32, #tpu.memory_space<vmem>>, vector<8x1xf32>
    %c0_10 = arith.constant 0 : index
    %c0_11 = arith.constant 0 : index
    %8 = vector.load %arg12[%c0_10, %c0_11] : memref<32x32xf32, #tpu.memory_space<vmem>>, vector<32x32xf32>
    %c0_12 = arith.constant 0 : index
    %c0_13 = arith.constant 0 : index
    %9 = vector.load %arg13[%c0_12, %c0_13] : memref<1x32xf32, #tpu.memory_space<vmem>>, vector<1x32xf32>
    %cst = arith.constant dense<0.000000e+00> : vector<8x8xf32>
    %10 = tpu.matmul %3, %4, %cst {dimension_numbers = #tpu.dot_dimension_numbers<[1], [1], [0], [0], [0, 0, 1, 0], [], []>, precision = #tpu.contract_precision<fp32>} : vector<8x32xf32>, vector<8x32xf32>, vector<8x8xf32> -> vector<8x8xf32>
    %11 = arith.mulf %10, %6 : vector<8x8xf32>
    %cst_14 = arith.constant dense<0.000000e+00> : vector<8x32xf32>
    %12 = tpu.matmul %3, %8, %cst_14 {dimension_numbers = #tpu.dot_dimension_numbers<[1], [0], [0], [1], [0, 0, 1, 1], [], []>, precision = #tpu.contract_precision<fp32>} : vector<8x32xf32>, vector<32x32xf32>, vector<8x32xf32> -> vector<8x32xf32>
    %cst_15 = arith.constant dense<0.000000e+00> : vector<8x32xf32>
    %13 = tpu.matmul %11, %5, %cst_15 {dimension_numbers = #tpu.dot_dimension_numbers<[1], [0], [0], [1], [0, 0, 1, 1], [], []>, precision = #tpu.contract_precision<fp32>} : vector<8x8xf32>, vector<8x32xf32>, vector<8x32xf32> -> vector<8x32xf32>
    %14 = vector.broadcast %7 : vector<8x1xf32> to vector<8x32xf32>
    %15 = arith.mulf %14, %12 : vector<8x32xf32>
    %16 = arith.addf %15, %13 : vector<8x32xf32>
    %17 = vector.broadcast %9 : vector<1x32xf32> to vector<8x32xf32>
    %18 = arith.mulf %3, %17 : vector<8x32xf32>
    %cst_16 = arith.constant dense<0.000000e+00> : vector<8xf32>
    %19 = vector.multi_reduction <add>, %18, %cst_16 [1] : vector<8x32xf32> to vector<8xf32>
    %20 = vector.shape_cast %19 : vector<8xf32> to vector<8x1xf32>
    %21 = arith.mulf %7, %20 : vector<8x1xf32>
    %cst_17 = arith.constant dense<0.000000e+00> : vector<8xf32>
    %22 = vector.multi_reduction <add>, %11, %cst_17 [1] : vector<8x8xf32> to vector<8xf32>
    %23 = vector.shape_cast %22 : vector<8xf32> to vector<8x1xf32>
    %24 = arith.addf %21, %23 : vector<8x1xf32>
    %25 = math.absf %24 : vector<8x1xf32>
    %cst_18 = arith.constant 1.000000e+00 : f32
    %26 = vector.broadcast %cst_18 : f32 to vector<8x1xf32>
    %27 = arith.maximumf %25, %26 : vector<8x1xf32>
    %c0_19 = arith.constant 0 : index
    %c0_20 = arith.constant 0 : index
    %28 = vector.load %arg5[%c0_19, %c0_20] : memref<8x32xf32, #tpu.memory_space<vmem>>, vector<8x32xf32>
    %29 = vector.broadcast %27 : vector<8x1xf32> to vector<8x32xf32>
    %30 = arith.divf %16, %29 : vector<8x32xf32>
    %31 = arith.mulf %28, %30 : vector<8x32xf32>
    %c0_21 = arith.constant 0 : index
    %c0_22 = arith.constant 0 : index
    %32 = vector.load %arg11[%c0_21, %c0_22] : memref<8x32xf32, #tpu.memory_space<vmem>>, vector<8x32xf32>
    tpu.vector_store %arg11[%c0_21, %c0_22], %31 {strides = array<i32>} : memref<8x32xf32, #tpu.memory_space<vmem>>, vector<8x32xf32>,
    %33 = arith.index_cast %arg0 : i32 to index
    %34 = memref.load %arg1[%33] : memref<3xf32, #tpu.memory_space<smem>>
    %c0_23 = arith.constant 0 : index
    %c0_24 = arith.constant 0 : index
    %35 = vector.load %arg8[%c0_23, %c0_24] : memref<8x1xf32, #tpu.memory_space<vmem>>, vector<8x1xf32>
    %36 = vector.broadcast %35 : vector<8x1xf32> to vector<8x32xf32>
    %37 = arith.mulf %36, %4 : vector<8x32xf32>
    %38 = vector.broadcast %34 : f32 to vector<32x32xf32>
    %39 = arith.mulf %38, %8 : vector<32x32xf32>
    %cst_25 = arith.constant dense<0.000000e+00> : vector<32x32xf32>
    %40 = tpu.matmul %37, %5, %cst_25 {dimension_numbers = #tpu.dot_dimension_numbers<[0], [0], [1], [1], [0, 1, 1, 1], [], []>, precision = #tpu.contract_precision<fp32>} : vector<8x32xf32>, vector<8x32xf32>, vector<32x32xf32> -> vector<32x32xf32>
    %41 = arith.addf %39, %40 : vector<32x32xf32>
    %c0_26 = arith.constant 0 : index
    %c0_27 = arith.constant 0 : index
    %42 = vector.load %arg12[%c0_26, %c0_27] : memref<32x32xf32, #tpu.memory_space<vmem>>, vector<32x32xf32>
    tpu.vector_store %arg12[%c0_26, %c0_27], %41 {strides = array<i32>} : memref<32x32xf32, #tpu.memory_space<vmem>>, vector<32x32xf32>,
    %43 = vector.broadcast %34 : f32 to vector<1x32xf32>
    %44 = arith.mulf %43, %9 : vector<1x32xf32>
    %cst_28 = arith.constant dense<0.000000e+00> : vector<32xf32>
    %45 = vector.multi_reduction <add>, %37, %cst_28 [0] : vector<8x32xf32> to vector<32xf32>
    %46 = vector.shape_cast %45 : vector<32xf32> to vector<1x32xf32>
    %47 = arith.addf %44, %46 : vector<1x32xf32>
    %c0_29 = arith.constant 0 : index
    %c0_30 = arith.constant 0 : index
    %48 = vector.load %arg13[%c0_29, %c0_30] : memref<1x32xf32, #tpu.memory_space<vmem>>, vector<1x32xf32>
    tpu.vector_store %arg13[%c0_29, %c0_30], %47 {strides = array<i32>} : memref<1x32xf32, #tpu.memory_space<vmem>>, vector<1x32xf32>,
    return
  }
  func.func @transform_0(%arg0: i32) -> i32 {
    %c0_i32 = arith.constant 0 : i32
    %c0_i32_0 = arith.constant 0 : i32
    return %c0_i32 : i32
  }
  func.func @transform_1(%arg0: i32) -> (i32, i32) {
    %c0_i32 = arith.constant 0 : i32
    %c0_i32_0 = arith.constant 0 : i32
    return %arg0, %c0_i32 : i32, i32
  }
  func.func @transform_2(%arg0: i32) -> (i32, i32) {
    %c0_i32 = arith.constant 0 : i32
    %c0_i32_0 = arith.constant 0 : i32
    return %arg0, %c0_i32 : i32, i32
  }
  func.func @transform_3(%arg0: i32) -> (i32, i32) {
    %c0_i32 = arith.constant 0 : i32
    %c0_i32_0 = arith.constant 0 : i32
    return %arg0, %c0_i32 : i32, i32
  }
  func.func @transform_4(%arg0: i32) -> (i32, i32) {
    %c0_i32 = arith.constant 0 : i32
    %c0_i32_0 = arith.constant 0 : i32
    return %arg0, %c0_i32 : i32, i32
  }
  func.func @transform_5(%arg0: i32) -> (i32, i32) {
    %c0_i32 = arith.constant 0 : i32
    %c0_i32_0 = arith.constant 0 : i32
    return %arg0, %c0_i32 : i32, i32
  }
  func.func @transform_6(%arg0: i32) -> (i32, i32) {
    %c0_i32 = arith.constant 0 : i32
    %c0_i32_0 = arith.constant 0 : i32
    return %arg0, %c0_i32 : i32, i32
  }
  func.func @transform_7(%arg0: i32) -> (i32, i32) {
    %c0_i32 = arith.constant 0 : i32
    %c0_i32_0 = arith.constant 0 : i32
    return %arg0, %c0_i32 : i32, i32
  }
  func.func @transform_8(%arg0: i32) -> (i32, i32) {
    %c0_i32 = arith.constant 0 : i32
    %c0_i32_0 = arith.constant 0 : i32
    %c0_i32_1 = arith.constant 0 : i32
    return %c0_i32, %c0_i32_0 : i32, i32
  }
  func.func @transform_9(%arg0: i32) -> (i32, i32) {
    %c0_i32 = arith.constant 0 : i32
    %c0_i32_0 = arith.constant 0 : i32
    %c0_i32_1 = arith.constant 0 : i32
    return %c0_i32, %c0_i32_0 : i32, i32
  }
  func.func @transform_10(%arg0: i32) -> (i32, i32) {
    %c0_i32 = arith.constant 0 : i32
    %c0_i32_0 = arith.constant 0 : i32
    return %arg0, %c0_i32 : i32, i32
  }
  func.func @transform_11(%arg0: i32) -> (i32, i32) {
    %c0_i32 = arith.constant 0 : i32
    %c0_i32_0 = arith.constant 0 : i32
    %c0_i32_1 = arith.constant 0 : i32
    return %c0_i32, %c0_i32_0 : i32, i32
  }
  func.func @transform_12(%arg0: i32) -> (i32, i32) {
    %c0_i32 = arith.constant 0 : i32
    %c0_i32_0 = arith.constant 0 : i32
    %c0_i32_1 = arith.constant 0 : i32
    return %c0_i32, %c0_i32_0 : i32, i32
  }
}

</mosaic_0001>

<bundles_post_ra>
// kernel: mlstm_sequence.1
= control target key start
LH: loop header
LB: loop body
LE: loop exit
PB: predicated region body
PF: predicated region fallthrough
CT: control target
= control target key end

     0   :  { %s3904_s0 = inlined_call_operand.vmem [shape: f32[3], index: 0, kind: input, shape index: {}]   ;;  %s3905_s1 = inlined_call_operand.vmem [shape: f32[24,32], index: 1, kind: input, shape index: {}]   ;;  %s3906_s2 = inlined_call_operand.vmem [shape: f32[24,32], index: 2, kind: input, shape index: {}]   ;;  %s3907_s3 = inlined_call_operand.vmem [shape: f32[24,32], index: 3, kind: input, shape index: {}]   ;;  %s3908_s4 = inlined_call_operand.vmem [shape: f32[24,32], index: 4, kind: input, shape index: {}]   ;;  %s3909_s5 = inlined_call_operand.vmem [shape: f32[24,8], index: 5, kind: input, shape index: {}]   ;;  %s3910_s6 = inlined_call_operand.vmem [shape: f32[24,1], index: 6, kind: input, shape index: {}]   ;;  %s3911_s7 = inlined_call_operand.vmem [shape: f32[24,1], index: 7, kind: input, shape index: {}]   ;;  %s3912_s8 = inlined_call_operand.vmem [shape: f32[32,32], index: 8, kind: input, shape index: {}]   ;;  %s3913_s9 = inlined_call_operand.vmem [shape: f32[1,32], index: 9, kind: input, shape index: {}]   ;;  %s3914_s10 = inlined_call_operand.hbm [shape: f32[24,32], index: 10, kind: output, shape index: {0}]   ;;  %s3915_s11 = inlined_call_operand.vmem [shape: f32[32,32], index: 11, kind: output, shape index: {1}]   ;;  %s3916_s12 = inlined_call_operand.hbm [shape: f32[1,32], index: 12, kind: output, shape index: {2}]  }
   0x1   :  { %3929 = sst [smem:[#allocation19_spill]] %s3904_s0 }
   0x2   :  { %3930 = sst [smem:[#allocation20_spill]] %s3905_s1 }
   0x3   :  { %3931 = sst [smem:[#allocation21_spill]] %s3914_s10 }
   0x4   :  { %18 = vsyncpa [#allocation4], 0 }
   0x5   :  { %19 = vsyncpa [#allocation3], 0 }
   0x6   :  { %21 = vsyncpa [#allocation3 + $0x1], 0 }
   0x7   :  { %22 = vsyncpa [#allocation7], 0  ;;  %s3411_s21 = smov 0   ;;  %s3413_s22 = smov 0  }
   0x8   :  { %s3415_s23 = smov 0   ;;  %s3417_s24 = smov 0  }
   0x9 LB: > { %3932 = sst [smem:[#allocation11_spill]] %s3325_s21  ;;  %s3432_s25 = sadd.s32 4294967295, %s3337_s24   ;;  %s3337_s24 = sphi %s3417_s24, %s3961_s24   ;;  %s3333_s23 = sphi %s3415_s23, %s3964_s23   ;;  %s3329_s22 = sphi %s3413_s22, %s3963_s22   ;;  %s3325_s21 = sphi %s3411_s21, %s3962_s21  }
   0xa   : > { %3933 = sst [smem:[#allocation12_spill]] %s3329_s22  ;;  %s2806_s26 = sadd.s32 4294967294, %s3337_s24  }
   0xb   : > { %3934 = sst [smem:[#allocation13_spill]] %s3333_s23  ;;  %s3436_s27 = sadd.s32 1, %s3337_s24  }
   0xc   : > { %3935 = sst [smem:[#allocation14_spill]] %s3337_s24  ;;  %s280_s28 = sadd.s32 1, %s3333_s23 }
   0xd   : > { %3936 = sst [smem:[#allocation15_spill]] %s3436_s27  ;;  %s277_s29 = ssub.s32 %s3337_s24, %s3436_s27 }
   0xe   : > { %p290_p0 = scmp.ne.s32.totalorder %s3333_s23, %s3329_s22  ;;  %p278_p1 = scmp.eq.s32.totalorder %s277_s29, 0 }
   0xf   : > { %p3917_p2 = scmp.eq.s32.totalorder %s3432_s25, 2  ;;  %p296_p3 = scmp.ne.s32.totalorder %s3329_s22, %s3325_s21 }
  0x10   : > { %p297_p4 = scmp.eq.s32.totalorder %s2806_s26, 2  ;;  %p2807_p7 = scmp.ge.s32.totalorder %s3337_s24, 1 }
  0x11   : > { %s3447_s30 = scalar_select %p278_p1, %s3333_s23, %s280_s28  }
  0x12   : > { %p3451_p5 = por %p3917_p2, %p290_p0  ;;  %p3455_p6 = por %p297_p4, %p296_p3 }
  0x13   : > { %3937 = sst [smem:[#allocation16_spill]] %s3447_s30  ;;  %p346_p8 = scmp.lt.s32.totalorder %s3337_s24, 4 }
  0x14   : > { %s3938_s13 = scalar_select %p3451_p5, 1, 0 }
  0x15   : > { %s3940_s14 = scalar_select %p3455_p6, 1, 0 }
  0x16   : > { %3939 = sst [smem:[#allocation17_spill]] %s3938_s13  ;;  %p3179_p10 = scmp.eq.s32.totalorder %s3432_s25, 0 }
  0x17   : > { %3941 = sst [smem:[#allocation18_spill]] %s3940_s14  ;;  %p3463_p11 = pnand %p2807_p7, %p346_p8 }
  0x18   : > { %s3943_s0 = sld [smem:[#allocation19_spill]] }
  0x19   : > { %p3171_p12 = pneg %p3463_p11 }
  0x1b   : > { %p3172_p13 = pnand %p3179_p10, %p3171_p12 }
  0x1d   : > { %p3228_p1 = pneg %p3172_p13 }
  0x1e   : > { %s359_s18 = sshll.u32 %s3943_s0, 4  ;;  %s360_s18 = int_to_ptr.vmem [resolvable:$true] %s359_s18 }
  0x1f   : > { %s3226_s19 = scalar_lea.vmem %s360_s18, 16  ;;  %p3234_p2 = scmp.lt.s32.totalorder %s360_s18, %s360_s18 }
  0x20   : > { %p3227_p0 = scmp.ne.s32.totalorder %s360_s18, %s3226_s19  ;;  %p3235_p7 = scmp.lt.s32.totalorder %s3226_s19, %s3226_s19 }
  0x22   : > { %p3229_p3 = pnand %p3228_p1, %p3227_p0  ;;  %p3236_p8 = por %p3235_p7, %p3234_p2 }
  0x24   : > { %p3230_p4 = pneg %p3229_p3 }
  0x26   : > { %p3237_p9 = pnand %p3236_p8, %p3230_p4 }
  0x28   : > { %3240 = shalt.err (!%p3237_p9)
}
  0x29   : > { %s3339_s20 = smov [#allocation2]   ;;  %427 = sbr.rel (%p3463_p11) target bundleno = 644 (0x284), region = 60 }
  0x2a   : > { %3174 = dma.vmem_to_smem (!%p3172_p13), %s360_s18, 16, %s3339_s20, [#allocation4]  }
  0x30   : > { %3312 = dma.done.wait (%p3179_p10), [#allocation4], 16  }
  0x31   : > { %3314 = vsyncadd (%p3179_p10), [#allocation4], 4294967280 }
  0x32   : > { %433 = sfence }
  0x33   : > { %s3918_s26 = sand.u32 1, %s3329_s22   ;;  %p493_p2 = scmp.lt.s32.totalorder %s3432_s25, 2 }
  0x34   : > { %s3484_s28 = sshll.u32 %s3918_s26, 3  ;;  %s3944_s1 = sld [smem:[#allocation20_spill]] }
  0x35   : > { %s494_s29 = scalar_select %p493_p2, %s3432_s25, 2 }
  0x36   : > { %p3945_p9 = scmp.ne.s32.totalorder %s3432_s25, 0 }
  0x37   : > { %s3487_s15 = sshll.u32 %s494_s29, 3  ;;  %v525_v0 = vld [vmem:[%s3912_s8] sm:$0xff] (!%p3945_p9)  ;;  %vm529_vm0 = vcmask (!%p3945_p9), 261120   ;;  %v526_v1 = vld [vmem:[%s3912_s8 + $0x8] sm:$0xff] (!%p3945_p9)  ;;  %v527_v2 = vld [vmem:[%s3912_s8 + $0x10] sm:$0xff] (!%p3945_p9)  ;;  %vm535_vm1 = vcmask (!%p3945_p9), 253952  }
  0x38   : > { %s500_s26 = scalar_lea.vmem %s3906_s2, %s3487_s15  ;;  %s504_s29 = scalar_lea.vmem %s3907_s3, %s3487_s15  ;;  %530 = vst.msk [vmem:[%s3915_s11] sm:$0xff] (!%p3945_p9), %vm529_vm0, %v525_v0  ;;  %531 = vst.msk [vmem:[%s3915_s11 + $0x8] sm:$0xff] (!%p3945_p9), %vm529_vm0, %v526_v1  ;;  %v528_v3 = vld [vmem:[%s3912_s8 + $0x18] sm:$0xff] (!%p3945_p9)  ;;  %v534_v4 = vld [vmem:[%s3913_s9] sm:$0x1] (!%p3945_p9) }
  0x39   : > { %s512_s21 = scalar_lea.vmem %s3909_s5, %s3487_s15  ;;  %s520_s19 = scalar_lea.vmem %s3911_s7, %s3487_s15  ;;  %532 = vst.msk [vmem:[%s3915_s11 + $0x10] sm:$0xff] (!%p3945_p9), %vm529_vm0, %v527_v2  ;;  %533 = vst.msk [vmem:[%s3915_s11 + $0x18] sm:$0xff] (!%p3945_p9), %vm529_vm0, %v528_v3 }
  0x3a   : > { %s496_s18 = scalar_lea.vmem %s3944_s1, %s3487_s15  ;;  %s516_s1 = scalar_lea.vmem %s3910_s6, %s3487_s15  ;;  %536 = vst.msk [vmem:[#allocation6] sm:$0x1] (!%p3945_p9), %vm535_vm1, %v534_v4 }
  0x3b   : > { %524 = sbr.rel (%p3945_p9) target bundleno = 66 (0x42), region = 68 }
  0x42 PF: > { %v3547_v5 = vld [vmem:[%s500_s26] sm:$0xff]  ;;  %vm547_vm2 = vcmask 261120   ;;  %v3340_v7 = vmov 0.0   ;;  %vm3341_vm3 = vmmov 0   ;;  %v3342_v13 = vmov 0   ;;  %v3592_v23 = vld [vmem:[%s3915_s11 + $0x8] sm:$0xff] }
  0x43   : > { %v3549_v6 = vld [vmem:[%s496_s18] sm:$0xff]  ;;  %2911 = vmatprep.subr.mxu0 %v3340_v7  ;;  %v552_v8 = vsel %vm547_vm2, %v3547_v5, 0  ;;  %2913 = vmatprep.mubr.msk.f32.mxu0 %vm3341_vm3, %v3340_v7  ;;  %v3597_v24 = vld [vmem:[%s3915_s11 + $0x10] sm:$0xff]  ;;  %v1944_v25 = vlaneseq  ;;  %v3343_v26 = vmov 0.0|0.0   ;;  %v1005_v28 = vand.u32 4294901760, %v3592_v23  ;;  %v3605_v29 = vld [vmem:[%s3915_s11 + $0x18] sm:$0xff] }
  0x44   : > { %v549_v9 = vsel %vm547_vm2, %v3549_v6, 0  ;;  %v1971_v10 = vld [vmem:[%s520_s19] sm:$0xff]  ;;  %v3558_v11 = vand.u32 4294901760, %v552_v8  ;;  %3222 = vset.pattern.permute.xlu0 %v3342_v13  ;;  %2949 = vmatprep.mubr.msk.f32.mxu1 %vm3341_vm3, %v3340_v7  ;;  %v1008_v30 = vand.u32 4294901760, %v3597_v24  ;;  %v1011_v31 = vand.u32 4294901760, %v3605_v29  ;;  %s1970_s17 = sld [smem:[#allocation2 + %s3432_s25]] }
  0x45   : > { %v3560_v12 = vand.u32 4294901760, %v549_v9  ;;  %1974 = vperm.xlu0 %3222, %v1971_v10   ;;  %3223 = vset.pattern.permute.xlu1 %v3342_v13  ;;  %v3587_v22 = vld [vmem:[%s3915_s11] sm:$0xff]  ;;  %v1945_v32 = vshrl.u32 %v1944_v25, 7  ;;  %v3615_v35 = vsub.f32 %v3592_v23, %v1005_v28  ;;  %v3629_v43 = vld [vmem:[#allocation6] sm:$0x1]  ;;  %vm2619_vm4 = vcmask 253952  }
  0x46   : > { %2912 = vmatpush3.xpose.msra.mxu0 %v3558_v11  ;;  %v3566_v14 = vsub.f32 %v552_v8, %v3558_v11  ;;  %3085 = vmatprep.subr.bf16.mxu1 %v3343_v26  ;;  %v1002_v27 = vand.u32 4294901760, %v3587_v22  ;;  %v3618_v36 = vsub.f32 %v3597_v24, %v1008_v30  ;;  %v3621_v37 = vsub.f32 %v3605_v29, %v1011_v31  ;;  %s3344_s16 = smov [#allocation6]   ;;  %p3946_p11 = scmp.eq.s32.totalorder %s3432_s25, 2 }
  0x47   : > { %v3569_v15 = vsub.f32 %v549_v9, %v3560_v12  ;;  %2916 = vmatprep.subr.mxu0 %v3340_v7  ;;  %v1946_v38 = vsub.s32 0, %v1945_v32  ;;  %v3624_v39 = vpack.c.bf16 %v1011_v31, %v1008_v30  ;;  %v1090_v41 = vand.u32 4294901760, %v3615_v35  ;;  %s2649_s10 = sshll.u32 %s3344_s16, 4  ;;  %s2650_s10 = int_to_ptr.vmem [resolvable:$true] %s2649_s10 }
  0x48   : > { %v633_v17 = vand.u32 4294901760, %v3566_v14  ;;  %v3609_v33 = vpack.c.bf16 %v1005_v28, %v1002_v27  ;;  %v3612_v34 = vsub.f32 %v3587_v22, %v1002_v27  ;;  %v1097_v42 = vand.u32 4294901760, %v3618_v36  ;;  %s3241_s14 = scalar_lea.vmem %s2650_s10, 16  ;;  %s3247_s26 = scalar_lea.vmem %s2650_s10, 32 }
  0x49   : > { %v3573_v16 = vand.u32 4294901760, %v3569_v15  ;;  %v1104_v44 = vand.u32 4294901760, %v3621_v37  ;;  %v1947_v45 = vrot.slane %v3629_v43, %v1946_v38  ;;  %v1091_v47 = vsub.f32 %v3615_v35, %v1090_v41  ;;  %p3242_p10 = scmp.ne.s32.totalorder %s2650_s10, %s3241_s14  ;;  %p3248_p0 = scmp.lt.s32.totalorder %s2650_s10, %s2650_s10 }
  0x4a   : > { %v634_v19 = vsub.f32 %v3566_v14, %v633_v17  ;;  %3087 = vmatpush3.bf16.msra.mxu1 %v3609_v33  ;;  %v1083_v40 = vand.u32 4294901760, %v3612_v34  ;;  %v1098_v48 = vsub.f32 %v3618_v36, %v1097_v42  ;;  %v3098_v58 = vpack.c.bf16 %v3615_v35, %v3612_v34  ;;  %p3249_p1 = scmp.lt.s32.totalorder %s3247_s26, %s3241_s14 }
  0x4b   : > { %v623_v18 = vsub.f32 %v3569_v15, %v3573_v16  ;;  %3088 = vmatprep.subr.bf16.mxu1 %v3343_v26  ;;  %v1105_v49 = vsub.f32 %v3621_v37, %v1104_v44  ;;  %v1949_v50 = vmul.f32 %v1947_v45, %v3549_v6  ;;  %v1092_v52 = vand.u32 4294901760, %v1091_v47  ;;  %p3243_p12 = pnand %p3242_p10, %p3946_p11 }
  0x4c   : > { %v635_v21 = vand.u32 4294901760, %v634_v19  ;;  %v1084_v46 = vsub.f32 %v3612_v34, %v1083_v40  ;;  %v1099_v53 = vand.u32 4294901760, %v1098_v48  ;;  %v3101_v59 = vpack.c.bf16 %v3621_v37, %v3618_v36  ;;  %p3250_p3 = por %p3249_p1, %p3248_p0 }
  0x4d   : > { %v624_v20 = vand.u32 4294901760, %v623_v18  ;;  %v1106_v54 = vand.u32 4294901760, %v1105_v49  ;;  %v1950_v55 = vsel %vm547_vm2, %v1949_v50, 0.0  ;;  %v3110_v60 = vpack.c.bf16 %v1090_v41, %v1083_v40  ;;  %v540_v18 = vld [vmem:[%s512_s21] sm:$0xff]  ;;  %p3244_p13 = pneg %p3243_p12 }
  0x4e   : > { %3090 = vmatpush3.bf16.msra.mxu1 %v3624_v39  ;;  %v1085_v51 = vand.u32 4294901760, %v1084_v46  ;;  %1951 = vadd.xlane.f32.xlu1 %v1950_v55  ;;  %v3113_v2 = vpack.c.bf16 %v1104_v44, %v1097_v42  ;;  %v3702_v4 = vstv %s1970_s17  ;;  %vm1486_vm5 = vcmask 64512  }
  0x4f   : > { %2914 = vmatmul.mubr.f32.vlgmr.msra.gmra.mrb[0].mxu0 %v624_v20  ;;  %3091 = vmatprep.subr.bf16.mxu1 %v3343_v26  ;;  %v3095_v57 = vpack.c.bf16 %v1106_v54, %v1099_v53  ;;  %v2610_v10 = vmul.f32 %v3702_v4, %v3629_v43  ;;  %p3251_p4 = pnand %p3250_p3, %p3244_p13 }
  0x50   : > { %2917 = vmatpush3.xpose.msra.mxu0 %v635_v21  ;;  %2918 = vmatprep.mubr.msk.f32.mxu0 %vm3341_vm3, %v3340_v7  ;;  %v3092_v56 = vpack.c.bf16 %v1092_v52, %v1085_v51 }
  0x51   : > { %2921 = vmatprep.subr.mxu0 %v3340_v7  ;;  %2950 = vmatmul.mubr.f32.vlgmr.msra.gmra.mrb[0].mxu1 %v624_v20 }
  0x52   : > { %3093 = vmatpush3.bf16.msra.mxu1 %v3092_v56  ;;  %2960 = vmatprep.mubr.msk.f32.mxu1 %vm3341_vm3, %v3340_v7 }
  0x53   : > { %3094 = vmatprep.subr.bf16.mxu1 %v3343_v26 }
  0x56   : > { %3096 = vmatpush3.bf16.msra.mxu1 %v3095_v57 }
  0x57   : > { %2919 = vmatmul.mubr.f32.vlgmr.msra.gmra.mrb[0].mxu0 %v3560_v12  ;;  %3097 = vmatprep.subr.bf16.mxu1 %v3343_v26 }
  0x58   : > { %2922 = vmatpush3.xpose.msra.mxu0 %v3566_v14  ;;  %2923 = vmatprep.mubr.msk.f32.mxu0 %vm3341_vm3, %v3340_v7 }
  0x59   : > { %2926 = vmatprep.subr.mxu0 %v3340_v7  ;;  %2961 = vmatmul.mubr.f32.vlgmr.msra.gmra.mrb[0].mxu1 %v3560_v12 }
  0x5a   : > { %3099 = vmatpush3.bf16.msra.mxu1 %v3098_v58  ;;  %2971 = vmatprep.mubr.msk.f32.mxu1 %vm3341_vm3, %v3340_v7 }
  0x5b   : > { %3100 = vmatprep.subr.bf16.mxu1 %v3343_v26 }
  0x5e   : > { %3102 = vmatpush3.bf16.msra.mxu1 %v3101_v59 }
  0x5f   : > { %2924 = vmatmul.mubr.f32.vlgmr.msra.gmra.mrb[0].mxu0 %v3569_v15  ;;  %3103 = vmatprep.subr.bf16.mxu1 %v3343_v26 }
  0x60   : > { %2927 = vmatpush3.xpose.msra.mxu0 %v3558_v11  ;;  %2928 = vmatprep.mubr.msk.f32.mxu0 %vm3341_vm3, %v3340_v7 }
  0x61   : > { %2931 = vmatprep.subr.mxu0 %v3340_v7  ;;  %2972 = vmatmul.mubr.f32.vlgmr.msra.gmra.mrb[0].mxu1 %v3569_v15 }
  0x62   : > { %3105 = vmatpush3.bf16.msra.mxu1 %v3609_v33  ;;  %2982 = vmatprep.mubr.msk.f32.mxu1 %vm3341_vm3, %v3340_v7 }
  0x63   : > { %3106 = vmatprep.subr.bf16.mxu1 %v3343_v26 }
  0x66   : > { %3108 = vmatpush3.bf16.msra.mxu1 %v3624_v39 }
  0x67   : > { %2929 = vmatmul.mubr.f32.vlgmr.msra.gmra.mrb[0].mxu0 %v3573_v16  ;;  %3109 = vmatprep.subr.bf16.mxu1 %v3343_v26 }
  0x68   : > { %2932 = vmatpush3.xpose.msra.mxu0 %v633_v17  ;;  %2933 = vmatprep.mubr.msk.f32.mxu0 %vm3341_vm3, %v3340_v7 }
  0x69   : > { %2936 = vmatprep.subr.mxu0 %v3340_v7  ;;  %2983 = vmatmul.mubr.f32.vlgmr.msra.gmra.mrb[0].mxu1 %v3573_v16 }
  0x6a   : > { %3111 = vmatpush3.bf16.msra.mxu1 %v3110_v60  ;;  %2993 = vmatprep.mubr.msk.f32.mxu1 %vm3341_vm3, %v3340_v7 }
  0x6b   : > { %3112 = vmatprep.subr.bf16.mxu1 %v3343_v26 }
  0x6e   : > { %3114 = vmatpush3.bf16.msra.mxu1 %v3113_v2 }
  0x6f   : > { %2934 = vmatmul.mubr.f32.vlgmr.msra.gmra.mrb[0].mxu0 %v3560_v12  ;;  %3115 = vmatprep.subr.bf16.mxu1 %v3343_v26 }
  0x70   : > { %2937 = vmatpush3.xpose.msra.mxu0 %v3558_v11  ;;  %2938 = vmatprep.mubr.msk.f32.mxu0 %vm3341_vm3, %v3340_v7 }
  0x71   : > { %3007 = vmatprep.subr.mxu0 %v3340_v7  ;;  %2994 = vmatmul.mubr.f32.vlgmr.msra.gmra.mrb[0].mxu1 %v3560_v12 }
  0x72   : > { %3117 = vmatpush3.bf16.msra.mxu1 %v3609_v33  ;;  %3004 = vmatprep.mubr.msk.f32.mxu1 %vm3341_vm3, %v3340_v7 }
  0x73   : > { %3118 = vmatprep.subr.bf16.mxu1 %v3343_v26 }
  0x76   : > { %3120 = vmatpush3.bf16.msra.mxu1 %v3624_v39 }
  0x77   : > { %2939 = vmatmul.mubr.f32.vlgmr.msra.gmra.mrb[0].mxu0 %v3560_v12 }
  0x78   : > { %3009 = vmatprep.mubr.msk.f32.mxu0 %vm3341_vm3, %v3340_v7 }
  0x79   : > { %3005 = vmatmul.mubr.f32.vlgmr.msra.gmra.mrb[0].mxu1 %v3560_v12 }
  0xc4   : > { %v1975_v61 = vpop.permute.xlu0 %1974 }
  0xc5   : > { %v1977_v62 = vmul.f32 %v1975_v61, %v3547_v5  ;;  %v539_v5 = vld [vmem:[%s504_s29] sm:$0xff] }
  0xc6   : > { %v3713_v9 = vand.u32 4294901760, %v539_v5 }
  0xc7   : > { %v2611_v63 = vsel %vm547_vm2, %v1977_v62, 0.0  ;;  %1983 = vxpose.xlu0.b32.start.end [1/1] (short) (narrow) %v1977_v62, 32  ;;  %v541_v62 = vld [vmem:[%s516_s1] sm:$0xff] }
  0xc8   : > { %v2612_v0 = vrot.slane %v2611_v63, 4  ;;  %3008 = vmatpush3.msra.mxu0 %v3713_v9  ;;  %v3720_v11 = vsub.f32 %v539_v5, %v3713_v9  ;;  %3037 = vmatprep.subr.mxu1 %v3713_v9 }
  0xc9   : > { %3012 = vmatprep.subr.mxu0 %v3340_v7  ;;  %3038 = vmatpush3.msra.mxu1 %v3713_v9 }
  0xca   : > { %v2613_v1 = vadd.f32 %v2612_v0, %v2611_v63  ;;  %v3725_v14 = vand.u32 4294901760, %v3720_v11 }
  0xcc   : > { %v2614_v3 = vrot.slane %v2613_v1, 2  ;;  %v1570_v16 = vsub.f32 %v3720_v11, %v3725_v14 }
  0xce   : > { %v2615_v6 = vadd.f32 %v2614_v3, %v2613_v1  ;;  %v1571_v17 = vand.u32 4294901760, %v1570_v16 }
  0xd0   : > { %v2616_v8 = vrot.slane %v2615_v6, 1  ;;  %3045 = vmatprep.subr.mxu1 %v1571_v17 }
  0xd2   : > { %v2617_v13 = vadd.f32 %v2616_v8, %v2615_v6 }
  0xd4   : > { %v2618_v15 = vadd.f32 %v2617_v13, %v2610_v10 }
  0xd6   : > { %2620 = vst.msk [vmem:[#allocation6] sm:$0x1] %vm2619_vm4, %v2618_v15 }
  0xdb   : > { %v1952_v61 = vpop.xlane.xlu1 %1951 }
  0xdc   : > { %v1953_v63 = vmul.f32 %v1952_v61, %v541_v62 }
 0x147   : > { %v1999_v19 = vpop.trf.xlu0 }
 0x148   : > { %v2016_v20 = vsel %vm1486_vm5, %v1999_v19, 0 }
 0x149   : > { %v3738_v25 = vand.u32 4294901760, %v2016_v20 }
 0x14a   : > { %v996_v21 = vpop.f32.mrb[0].mxu0 }
 0x14b   : > { %v1000_v26 = vmul.f32 %v996_v21, %v540_v18  ;;  %v2940_v27 = vpop.f32.mrb[1].mxu0  ;;  %v3741_v12 = vsub.f32 %v2016_v20, %v3738_v25  ;;  %v2000_v28 = vpop.trf.xlu0 }
 0x14c   : > { %v2019_v32 = vsel %vm1486_vm5, %v2000_v28, 0 }
 0x14d   : > { %v1488_v30 = vsel %vm1486_vm5, %v1000_v26, 0  ;;  %v1954_v31 = vsel %vm1486_vm5, %v1000_v26, 0.0  ;;  %v2095_v34 = vand.u32 4294901760, %v3741_v12  ;;  %v3747_v35 = vand.u32 4294901760, %v2019_v32 }
 0x14e   : > { %v1556_v33 = vand.u32 4294901760, %v1488_v30  ;;  %1955 = vadd.xlane.f32.xlu1 %v1954_v31 }
 0x14f   : > { %v2104_v37 = vsub.f32 %v2019_v32, %v3747_v35  ;;  %v2001_v38 = vpop.trf.xlu0  ;;  %v2096_v39 = vsub.f32 %v3741_v12, %v2095_v34 }
 0x150   : > { %v1557_v36 = vsub.f32 %v1488_v30, %v1556_v33  ;;  %v2022_v40 = vsel %vm1486_vm5, %v2001_v38, 0 }
 0x151   : > { %v2105_v42 = vand.u32 4294901760, %v2104_v37  ;;  %v3752_v43 = vand.u32 4294901760, %v2022_v40  ;;  %v2097_v44 = vand.u32 4294901760, %v2096_v39 }
 0x152   : > { %v1558_v41 = vand.u32 4294901760, %v1557_v36 }
 0x153   : > { %v2106_v45 = vsub.f32 %v2104_v37, %v2105_v42  ;;  %v2114_v47 = vsub.f32 %v2022_v40, %v3752_v43  ;;  %v2002_v48 = vpop.trf.xlu0  ;;  %3039 = vmatprep.mubr.f32.mxu1 %v2097_v44 }
 0x154   : > { %v1559_v46 = vsub.f32 %v1557_v36, %v1558_v41  ;;  %v2025_v49 = vsel %vm1486_vm5, %v2002_v48, 0 }
 0x155   : > { %v2107_v50 = vand.u32 4294901760, %v2106_v45  ;;  %v2115_v52 = vand.u32 4294901760, %v2114_v47  ;;  %v2123_v53 = vand.u32 4294901760, %v2025_v49 }
 0x156   : > { %v1560_v51 = vand.u32 4294901760, %v1559_v46 }
 0x157   : > { %v2124_v54 = vsub.f32 %v2025_v49, %v2123_v53  ;;  %3040 = vmatmul.mubr.f32.vlgmr.msra.gmra.mrb[2].mxu1 %v2107_v50  ;;  %v2116_v55 = vsub.f32 %v2114_v47, %v2115_v52 }
 0x158   : > { %3010 = vmatmul.mubr.f32.vlgmr.msra.gmra.mrb[2].mxu0 %v1560_v51  ;;  %3046 = vmatpush3.msra.mxu1 %v1571_v17 }
 0x159   : > { %3013 = vmatpush3.msra.mxu0 %v1571_v17  ;;  %3014 = vmatprep.mubr.msk.f32.mxu0 %vm3341_vm3, %v3340_v7  ;;  %v2125_v56 = vand.u32 4294901760, %v2124_v54  ;;  %v2117_v57 = vand.u32 4294901760, %v2116_v55 }
 0x15a   : > { %3017 = vmatprep.subr.mxu0 %v3340_v7  ;;  %3053 = vmatprep.subr.mxu1 %v3720_v11 }
 0x15b   : > { %3042 = vmatprep.mubr.f32.mxu1 %v2117_v57  ;;  %v2126_v58 = vsub.f32 %v2124_v54, %v2125_v56 }
 0x15c   : > { %3015 = vmatmul.mubr.f32.vlgmr.msra.gmra.mrb[4].mxu0 %v1556_v33 }
 0x15d   : > { %3018 = vmatpush3.msra.mxu0 %v3720_v11  ;;  %3019 = vmatprep.mubr.msk.f32.mxu0 %vm3341_vm3, %v3340_v7  ;;  %v2127_v59 = vand.u32 4294901760, %v2126_v58 }
 0x15e   : > { %3022 = vmatprep.subr.mxu0 %v3340_v7 }
 0x15f   : > { %3043 = vmatmul.mubr.f32.gmra.mrb[4].mxu1 %v2127_v59 }
 0x160   : > { %3020 = vmatmul.mubr.f32.vlgmr.msra.gmra.mrb[6].mxu0 %v1557_v36  ;;  %3047 = vmatprep.mubr.f32.mxu1 %v3738_v25 }
 0x161   : > { %3023 = vmatpush3.msra.mxu0 %v3713_v9  ;;  %3024 = vmatprep.mubr.msk.f32.mxu0 %vm3341_vm3, %v3340_v7 }
 0x162   : > { %3027 = vmatprep.subr.mxu0 %v3340_v7 }
 0x163   : > { %3048 = vmatmul.mubr.f32.vlgmr.msra.gmra.mrb[2].mxu1 %v3747_v35 }
 0x164   : > { %3025 = vmatmul.mubr.f32.vlgmr.msra.gmra.mrb[8].mxu0 %v1558_v41  ;;  %3050 = vmatprep.mubr.f32.mxu1 %v3752_v43 }
 0x165   : > { %3028 = vmatpush3.msra.mxu0 %v3725_v14  ;;  %3029 = vmatprep.mubr.msk.f32.mxu0 %vm3341_vm3, %v3340_v7 }
 0x166   : > { %3032 = vmatprep.subr.mxu0 %v3340_v7  ;;  %3054 = vmatpush3.msra.mxu1 %v3720_v11 }
 0x167   : > { %3051 = vmatmul.mubr.f32.gmra.mrb[4].mxu1 %v2123_v53 }
 0x168   : > { %3030 = vmatmul.mubr.f32.vlgmr.msra.gmra.mrb[10].mxu0 %v1556_v33  ;;  %3055 = vmatprep.mubr.f32.mxu1 %v3741_v12 }
 0x169   : > { %3033 = vmatpush3.msra.mxu0 %v3713_v9  ;;  %3034 = vmatprep.mubr.msk.f32.mxu0 %vm3341_vm3, %v3340_v7  ;;  %v3792_v7 = vpop.f32.mrb[0].mxu1 }
 0x16a   : > { %3061 = vmatprep.subr.mxu0 %v3713_v9  ;;  %v3006_v60 = vpop.f32.mrb[1].mxu1 }
 0x16b   : > { %3056 = vmatmul.mubr.f32.vlgmr.msra.gmra.mrb[2].mxu1 %v2104_v37 }
 0x16c   : > { %3035 = vmatmul.mubr.f32.vlgmr.msra.gmra.mrb[12].mxu0 %v1556_v33  ;;  %3058 = vmatprep.mubr.f32.mxu1 %v2114_v47 }
 0x16d   : > { %3062 = vmatpush3.msra.mxu0 %v3713_v9  ;;  %3063 = vmatprep.mubr.f32.mxu0 %v2095_v34 }
 0x16e   : > { %3069 = vmatprep.subr.mxu0 %v3725_v14 }
 0x16f   : > { %3059 = vmatmul.mubr.f32.gmra.mrb[4].mxu1 %v2124_v54 }
 0x170   : > { %3064 = vmatmul.mubr.f32.vlgmr.msra.gmra.mrb[14].mxu0 %v2105_v42 }
 0x171   : > { %3066 = vmatprep.mubr.f32.mxu0 %v2115_v52  ;;  %3070 = vmatpush3.msra.mxu0 %v3725_v14 }
 0x172   : > { %3077 = vmatprep.subr.mxu0 %v3713_v9 }
 0x174   : > { %3067 = vmatmul.mubr.f32.gmra.mrb[16].mxu0 %v2125_v56 }
 0x175   : > { %3071 = vmatprep.mubr.f32.mxu0 %v3738_v25 }
 0x178   : > { %3072 = vmatmul.mubr.f32.vlgmr.msra.gmra.mrb[14].mxu0 %v3747_v35 }
 0x179   : > { %3074 = vmatprep.mubr.f32.mxu0 %v3752_v43  ;;  %3078 = vmatpush3.msra.mxu0 %v3713_v9 }
 0x17c   : > { %3075 = vmatmul.mubr.f32.gmra.mrb[16].mxu0 %v2123_v53 }
 0x17d   : > { %3079 = vmatprep.mubr.f32.mxu0 %v3738_v25 }
 0x180   : > { %3080 = vmatmul.mubr.f32.vlgmr.msra.gmra.mrb[14].mxu0 %v3747_v35 }
 0x181   : > { %3082 = vmatprep.mubr.f32.mxu0 %v3752_v43 }
 0x184   : > { %3083 = vmatmul.mubr.f32.gmra.mrb[16].mxu0 %v2123_v53 }
 0x1db   : > { %v1956_v0 = vpop.xlane.xlu1 %1955 }
 0x1dc   : > { %v1957_v1 = vadd.f32 %v1956_v0, %v1953_v63 }
 0x1de   : > { %v1958_v2 = vand.u32 2147483647, %v1957_v1 }
 0x1e0   : > { %v1959_v3 = vmax.f32 %v1958_v2, 1.0 }
 0x1e2   : > { %1963 = vperm.xlu1 %3223, %v1959_v3  }
 0x1e6   : > { %1938 = vperm.xlu1 %3223, %v541_v62  }
 0x1e7   : > { %3254 = shalt.err (!%p3251_p4)
}
 0x1e8   : > { %s3255_s19 = scalar_lea.hbm %s3916_s12, 16  ;;  %p3947_p8 = pmov %p3946_p11 }
 0x1e9   : > { %p3256_p7 = scmp.ne.s32.totalorder %s3916_s12, %s3255_s19  ;;  %p3261_p10 = scmp.lt.u32.totalorder %s3255_s19, %s3916_s12 }
 0x1eb   : > { %p3257_p2 = pnand %p3256_p7, %p3947_p8 }
 0x1ed   : > { %p3258_p9 = pneg %p3257_p2 }
 0x1ef   : > { %p3263_p11 = pnand %p3261_p10, %p3258_p9 }
 0x1f1   : > { %3266 = shalt.err (!%p3263_p11)
}
 0x1f2   : > { %p3948_p12 = pmov %p3947_p8  ;;  %v1980_v31 = vmul.f32 %v3702_v4, %v3592_v23  ;;  %v1979_v33 = vmul.f32 %v3702_v4, %v3587_v22  ;;  %v1982_v38 = vmul.f32 %v3702_v4, %v3605_v29  ;;  %v1981_v41 = vmul.f32 %v3702_v4, %v3597_v24  ;;  %s3949_s26 = sld [smem:[#allocation12_spill]] }
 0x1f3   : > { %s3951_s20 = scalar_lea.vmem %s3908_s4, %s3487_s15  ;;  %s2822_s22 = sshll.u32 %s3432_s25, 7 }
 0x1f4   : > { %3167 = dma.vmem_to_hbm [thread:$0]  (%p3948_p12), %s2650_s10, 16, %s3916_s12, [#allocation7]   ;;  %v1960_v47 = vld [vmem:[%s3951_s20] sm:$0xff] }
 0x1f5   : > { %s3952_s24 = scalar_lea.vmem [#allocation5], %s3484_s28  ;;  %s3953_s30 = sld [smem:[#allocation21_spill]] }
 0x1f6   : > { %s2635_s13 = sshll.u32 %s3952_s24, 4  ;;  %s3954_s23 = smov %s3952_s24  ;;  %s3855_s13 = int_to_ptr.vmem [resolvable:$true] %s2635_s13 }
 0x1f7   : > { %s3267_s27 = scalar_lea.vmem %s3855_s13, 128  ;;  %s3345_s16 = smov [#allocation5]  }
 0x1f8   : > { %s3955_s15 = sand.u32 1, %s3949_s26   ;;  %p3268_p13 = scmp.ne.s32.totalorder %s3855_s13, %s3267_s27 }
 0x1f9   : > { %s2622_s21 = scalar_lea.sflag [#allocation3], %s3955_s15  ;;  %s3271_s10 = sshll.u32 %s3345_s16, 4  ;;  %s3272_s10 = int_to_ptr.vmem [resolvable:$false] %s3271_s10 }
 0x1fa   : > { %p3269_p0 = pnand %p3268_p13, %p3451_p5  ;;  %s3273_s14 = scalar_lea.vmem %s3272_s10, 256 }
 0x1fb   : > { %s3853_s29 = scalar_lea.hbm %s3953_s30, %s2822_s22  ;;  %p3274_p3 = scmp.lt.s32.totalorder %s3855_s13, %s3272_s10 }
 0x1fc   : > { %p3270_p1 = pneg %p3269_p0  ;;  %p3275_p4 = scmp.lt.s32.totalorder %s3273_s14, %s3267_s27 }
 0x1fe   : > { %p3276_p7 = por %p3275_p4, %p3274_p3 }
 0x200   : > { %p3277_p8 = pnand %p3276_p7, %p3270_p1 }
 0x22b   : > { %v1562_v6 = vpop.f32.mrb[2].mxu0 }
 0x22c   : > { %v3011_v5 = vpop.f32.mrb[3].mxu0 }
 0x22f   : > { %v1638_v8 = vpop.f32.mrb[4].mxu0 }
 0x230   : > { %v1639_v9 = vadd.f32 %v1638_v8, %v1562_v6  ;;  %v3016_v10 = vpop.f32.mrb[5].mxu0 }
 0x233   : > { %v1712_v11 = vpop.f32.mrb[6].mxu0 }
 0x234   : > { %v1713_v13 = vadd.f32 %v1712_v11, %v1639_v9  ;;  %v3021_v14 = vpop.f32.mrb[7].mxu0 }
 0x237   : > { %v1786_v15 = vpop.f32.mrb[8].mxu0 }
 0x238   : > { %v1787_v16 = vadd.f32 %v1786_v15, %v1713_v13  ;;  %v3026_v17 = vpop.f32.mrb[9].mxu0 }
 0x23b   : > { %v1860_v18 = vpop.f32.mrb[10].mxu0 }
 0x23c   : > { %v1861_v19 = vadd.f32 %v1860_v18, %v1787_v16  ;;  %v3031_v20 = vpop.f32.mrb[11].mxu0 }
 0x23e   : > { %v3057_v25 = vpop.f32.mrb[2].mxu1 }
 0x23f   : > { %v1932_v21 = vpop.f32.mrb[12].mxu0  ;;  %v2297_v12 = vpop.f32.mrb[3].mxu1 }
 0x240   : > { %v1933_v26 = vadd.f32 %v1932_v21, %v1861_v19  ;;  %v3036_v27 = vpop.f32.mrb[13].mxu0 }
 0x242   : > { %v3060_v28 = vpop.f32.mrb[4].mxu1 }
 0x243   : > { %v2311_v30 = vpop.f32.mrb[5].mxu1 }
 0x253   : > { %v3081_v32 = vpop.f32.mrb[14].mxu0 }
 0x254   : > { %v3121_v34 = vadd.f32 %v3081_v32, %v3057_v25  ;;  %v2580_v35 = vpop.f32.mrb[15].mxu0 }
 0x255   : > { %v3122_v36 = vadd.f32 %v2580_v35, %v2297_v12 }
 0x256   : > { %v2603_v37 = vadd.f32 %v3121_v34, %v1980_v31 }
 0x257   : > { %v2602_v39 = vadd.f32 %v3122_v36, %v1979_v33  ;;  %v3084_v40 = vpop.f32.mrb[16].mxu0 }
 0x258   : > { %2607 = vst.msk [vmem:[%s3915_s11 + $0x8] sm:$0xff] %vm547_vm2, %v2603_v37  ;;  %v3123_v22 = vadd.f32 %v3084_v40, %v3060_v28  ;;  %v2592_v23 = vpop.f32.mrb[17].mxu0 }
 0x259   : > { %2606 = vst.msk [vmem:[%s3915_s11] sm:$0xff] %vm547_vm2, %v2602_v39  ;;  %v3124_v29 = vadd.f32 %v2592_v23, %v2311_v30 }
 0x25a   : > { %v2605_v42 = vadd.f32 %v3123_v22, %v1982_v38 }
 0x25b   : > { %v2604_v43 = vadd.f32 %v3124_v29, %v1981_v41 }
 0x25c   : > { %2609 = vst.msk [vmem:[%s3915_s11 + $0x18] sm:$0xff] %vm547_vm2, %v2605_v42 }
 0x25d   : > { %2608 = vst.msk [vmem:[%s3915_s11 + $0x10] sm:$0xff] %vm547_vm2, %v2604_v43 }
 0x261   : > { %v1964_v24 = vpop.permute.xlu1 %1963 }
 0x262   : > { %3224 = vrcp.f32 %v1964_v24 }
 0x265   : > { %v1939_v4 = vpop.permute.xlu1 %1938 }
 0x266   : > { %v1941_v44 = vmul.f32 %v1939_v4, %v3792_v7 }
 0x268   : > { %v1942_v45 = vadd.f32 %v1941_v44, %v1933_v26 }
 0x26c   : > { %v3225_v46 = vpop.eup %3224 }
 0x26d   : > { %v1967_v48 = vmul.f32 %v3225_v46, %v1942_v45 }
 0x26f   : > { %v1968_v49 = vmul.f32 %v1967_v48, %v1960_v47 }
 0x271   : > { %1969 = vst.msk [vmem:[%s3954_s23] sm:$0xff] %vm547_vm2, %v1968_v49 }
 0x272   : > { %3280 = shalt.err (!%p3277_p8)
}
 0x273   : > { %s3281_s28 = scalar_lea.hbm %s3853_s29, 128  ;;  %s3285_s19 = scalar_lea.hbm %s3953_s30, 384 }
 0x274   : > { %p3282_p2 = scmp.ne.s32.totalorder %s3853_s29, %s3281_s28  ;;  %p3286_p11 = scmp.lt.u32.totalorder %s3853_s29, %s3953_s30 }
 0x275   : > { %p3287_p12 = scmp.lt.u32.totalorder %s3285_s19, %s3281_s28  ;;  %p3289_p0 = scmp.lt.u32.totalorder %s3281_s28, %s3853_s29 }
 0x276   : > { %p3283_p9 = pnand %p3282_p2, %p3451_p5 }
 0x277   : > { %p3288_p13 = por %p3287_p12, %p3286_p11 }
 0x278   : > { %p3284_p10 = pneg %p3283_p9 }
 0x279   : > { %p3290_p1 = por %p3289_p0, %p3288_p13 }
 0x27b   : > { %p3291_p3 = pnand %p3290_p1, %p3284_p10 }
 0x27d   : > { %3294 = shalt.err (!%p3291_p3)
}
 0x27e   : > { %3165 = dma.vmem_to_hbm [thread:$0]  (%p3451_p5), %s3855_s13, 128, %s3853_s29, %s2622_s21  }
 0x27f   : > { %p3956_p4 = scmp.eq.s32.totalorder %s3432_s25, 2 }
 0x281   : > { %3316 = dma.done.wait (%p3956_p4), [#allocation7], 16   ;;  %p3957_p7 = pmov %p3956_p4 }
 0x283   : > { %3318 = vsyncadd (%p3957_p7), [#allocation7], 4294967280 }
 0x284 PF: > { %s3958_s24 = sld [smem:[#allocation14_spill]]  ;;  %s3959_s17 = sld [smem:[#allocation11_spill]] }
 0x28a   : > { %p3183_p8 = scmp.ge.s32.totalorder %s3958_s24, 2  ;;  %s2668_s23 = sand.u32 1, %s3959_s17  }
 0x28b   : > { %s2669_s15 = scalar_lea.sflag [#allocation3], %s2668_s23 }
 0x28c   : > { %p3176_p2 = pnand %p3183_p8, %p3455_p6 }
 0x28e   : > { %3320 = dma.done.wait (!%p3176_p2), %s2669_s15, 128  }
 0x28f   : > { %3322 = vsyncadd (!%p3176_p2), %s2669_s15, 4294967168  ;;  %s3961_s24 = sld [smem:[#allocation15_spill]]  ;;  %s3962_s21 = sld [smem:[#allocation12_spill]] }
 0x290   : > { %s3963_s22 = sld [smem:[#allocation13_spill]]  ;;  %s3964_s23 = sld [smem:[#allocation16_spill]] }
 0x295   : > { %p25_p5 = scmp.ge.s32.totalorder %s3961_s24, 5  }
 0x297   :  { %27 = sbr.rel (!%p25_p5) target bundleno = 9 (0x9), region = 138 }
 0x29e   :  { %2674 = vsyncpa [#allocation3], 1 }
 0x29f   :  { %2676 = vsyncpa [#allocation3 + $0x1], 1 }
 0x2a0   :  { %2677 = vsyncpa [#allocation7], 1 }
 0x2a1   :  { %2678 = vsyncpa [#allocation4], 1 }
 0x2a2   :  { %2680 = vsyncpa [#allocation4 + $0x1], 1 }

</bundles_post_ra>
